<compile_context>
chip_gen: v6e
topology: v6e:2x2x1
jax: 0.10.0
libtpu: 0.0.40
codegen_flags: <defaults>
</compile_context>

<pallas_src>
import jax
import jax.numpy as jnp
from jax.experimental import pallas as pl
from jax.experimental.pallas import tpu as pltpu

IN_FEATURES = 10
OUT_FEATURES = 20
BN_EPS = 1e-5


def _fused_linear_bn_kernel(x_ref, wp_ref, shift_ref, o_ref):
    # out = x @ W' + shift   (Linear + training-mode BatchNorm1d fully folded)
    y = jnp.dot(x_ref[...], wp_ref[...], preferred_element_type=jnp.float32)
    o_ref[...] = (y + shift_ref[...]).astype(o_ref.dtype)


def bn_after_linear(x, w, b, gamma, beta, *, max_tile_n=8192):
    """x: [N, 10]; w: [20, 10] (PyTorch Linear layout); b, gamma, beta: [20]."""
    del b  # Linear bias is exactly cancelled by BatchNorm's batch-mean subtraction.
    n, in_f = x.shape
    out_f = w.shape[0]

    xf = x.astype(jnp.float32)
    wf = w.astype(jnp.float32)

    # --- Full-batch statistics of y0 = x @ W^T via sum(x) and the Gram matrix.
    s_x = jnp.sum(xf, axis=0)                      # [in_f]
    gram = xf.T @ xf                               # [in_f, in_f]
    sum_y = wf @ s_x                               # [out_f]
    sumsq_y = jnp.sum((wf @ gram) * wf, axis=1)    # diag(W gram W^T), [out_f]
    inv_n = 1.0 / n
    mean = sum_y * inv_n
    # Biased (training-mode) variance. Note: E[y^2]-E[y]^2 in f32 can lose
    # precision when |mean| >> std; acceptable at these scales/inits.
    var = sumsq_y * inv_n - mean * mean
    inv_std = jax.lax.rsqrt(var + BN_EPS)

    # --- Fold BN into the Linear weight and a single broadcast shift.
    scale = gamma.astype(jnp.float32) * inv_std            # [out_f]
    shift = beta.astype(jnp.float32) - mean * scale        # [out_f]
    wp = wf.T * scale[None, :]                             # [in_f, out_f]
    shift2d = shift[None, :]                               # [1, out_f]

    # --- Batch tiling: sublane-aligned tiles; Pallas masks the partial tail.
    tile_n = min(max_tile_n, ((n + 7) // 8) * 8)
    num_tiles = pl.cdiv(n, tile_n)

    out = pl.pallas_call(
        _fused_linear_bn_kernel,
        out_shape=jax.ShapeDtypeStruct((n, out_f), jnp.float32),
        grid_spec=pltpu.PrefetchScalarGridSpec(
            num_scalar_prefetch=0,
            grid=(num_tiles,),
            in_specs=[
                pl.BlockSpec((tile_n, in_f), lambda t: (t, 0)),   # x tile
                pl.BlockSpec((in_f, out_f), lambda t: (0, 0)),    # folded W'
                pl.BlockSpec((1, out_f), lambda t: (0, 0)),       # shift row
            ],
            out_specs=pl.BlockSpec((tile_n, out_f), lambda t: (t, 0)),
        ),
        compiler_params=pltpu.CompilerParams(
            # Tiles are fully independent -> both v7x TensorCores can split the
            # batch axis; harmless on single-TC v5e/v6e.
            dimension_semantics=("parallel",),
            # ~16 MiB double-buffered footprint at tile_n=8192 (x and out tiles
            # are lane-padded to 128 in VMEM). Explicit limit so v5e's 16 MiB
            # default scoped budget does not block it; leaves headroom on v7x.
            vmem_limit_bytes=40 * 1024 * 1024,
        ),
    )(xf, wp, shift2d)

    # TODO(synk): training-mode BatchNorm1d also updates running_mean /
    # running_var; only the forward output is reproduced here.
    return out


if __name__ == "__main__":
    key = jax.random.PRNGKey(0)
    k_x, k_w, k_b = jax.random.split(key, 3)

    N = 8
    x = jax.random.normal(k_x, (N, IN_FEATURES), dtype=jnp.float32)

    # Parameter init mimicking torch.nn.Linear defaults:
    # U(-1/sqrt(in_features), 1/sqrt(in_features)) for weight and bias.
    bound = 1.0 / (IN_FEATURES ** 0.5)
    w = jax.random.uniform(k_w, (OUT_FEATURES, IN_FEATURES),
                           minval=-bound, maxval=bound, dtype=jnp.float32)
    b = jax.random.uniform(k_b, (OUT_FEATURES,),
                           minval=-bound, maxval=bound, dtype=jnp.float32)
    # BatchNorm1d defaults: gamma = 1, beta = 0.
    gamma = jnp.ones((OUT_FEATURES,), dtype=jnp.float32)
    beta = jnp.zeros((OUT_FEATURES,), dtype=jnp.float32)

    out = jax.block_until_ready(bn_after_linear(x, w, b, gamma, beta))

    # Pure-JAX reference (Linear + training-mode BatchNorm1d, bias included).
    y_ref = x @ w.T + b
    mean = y_ref.mean(axis=0, keepdims=True)
    var = ((y_ref - mean) ** 2).mean(axis=0, keepdims=True)
    ref = (y_ref - mean) / jnp.sqrt(var + BN_EPS) * gamma + beta

    assert out.shape == (N, OUT_FEATURES)
    assert jnp.allclose(out, ref, atol=2e-5, rtol=2e-5), (
        float(jnp.max(jnp.abs(out - ref))))

    print("KERNEL_OK")
</pallas_src>

<mosaic_0001>
module attributes {stable_mosaic.version = 11 : i64} {
  func.func @_fused_linear_bn_kernel(%arg0: i32, %arg1: memref<8x10xf32, #tpu.memory_space<vmem>>, %arg2: memref<10x20xf32, #tpu.memory_space<vmem>>, %arg3: memref<1x20xf32, #tpu.memory_space<vmem>>, %arg4: memref<8x20xf32, #tpu.memory_space<vmem>>) attributes {dimension_semantics = [#tpu.dimension_semantics<parallel>], iteration_bounds = array<i64: 1>, scalar_prefetch = 0 : i64, scratch_operands = 0 : i64, tpu.core_type = #tpu.core_type<tc>, window_params = [{transform_indices = @transform_0, window_bounds = array<i64: 8, 10>}, {pipeline_mode = #tpu.pipeline_mode<synchronous>, transform_indices = @transform_1, window_bounds = array<i64: 10, 20>}, {pipeline_mode = #tpu.pipeline_mode<synchronous>, transform_indices = @transform_2, window_bounds = array<i64: 1, 20>}, {transform_indices = @transform_3, window_bounds = array<i64: 8, 20>}]} {
    %c0 = arith.constant 0 : index
    %c0_0 = arith.constant 0 : index
    %0 = vector.load %arg1[%c0, %c0_0] : memref<8x10xf32, #tpu.memory_space<vmem>>, vector<8x10xf32>
    %c0_1 = arith.constant 0 : index
    %c0_2 = arith.constant 0 : index
    %1 = vector.load %arg2[%c0_1, %c0_2] : memref<10x20xf32, #tpu.memory_space<vmem>>, vector<10x20xf32>
    %cst = arith.constant dense<0.000000e+00> : vector<8x20xf32>
    %2 = tpu.matmul %0, %1, %cst {dimension_numbers = #tpu.dot_dimension_numbers<[1], [0], [0], [1], [0, 0, 1, 1], [], []>} : vector<8x10xf32>, vector<10x20xf32>, vector<8x20xf32> -> vector<8x20xf32>
    %c0_3 = arith.constant 0 : index
    %c0_4 = arith.constant 0 : index
    %3 = vector.load %arg3[%c0_3, %c0_4] : memref<1x20xf32, #tpu.memory_space<vmem>>, vector<1x20xf32>
    %4 = vector.broadcast %3 : vector<1x20xf32> to vector<8x20xf32>
    %5 = arith.addf %2, %4 : vector<8x20xf32>
    %c0_5 = arith.constant 0 : index
    %c0_6 = arith.constant 0 : index
    %6 = vector.load %arg4[%c0_5, %c0_6] : memref<8x20xf32, #tpu.memory_space<vmem>>, vector<8x20xf32>
    tpu.vector_store %arg4[%c0_5, %c0_6], %5 {strides = array<i32>} : memref<8x20xf32, #tpu.memory_space<vmem>>, vector<8x20xf32>,
    return
  }
  func.func @transform_0(%arg0: i32) -> (i32, i32) {
    %c0_i32 = arith.constant 0 : i32
    %c0_i32_0 = arith.constant 0 : i32
    return %arg0, %c0_i32 : i32, i32
  }
  func.func @transform_1(%arg0: i32) -> (i32, i32) {
    %c0_i32 = arith.constant 0 : i32
    %c0_i32_0 = arith.constant 0 : i32
    %c0_i32_1 = arith.constant 0 : i32
    return %c0_i32, %c0_i32_0 : i32, i32
  }
  func.func @transform_2(%arg0: i32) -> (i32, i32) {
    %c0_i32 = arith.constant 0 : i32
    %c0_i32_0 = arith.constant 0 : i32
    %c0_i32_1 = arith.constant 0 : i32
    return %c0_i32, %c0_i32_0 : i32, i32
  }
  func.func @transform_3(%arg0: i32) -> (i32, i32) {
    %c0_i32 = arith.constant 0 : i32
    %c0_i32_0 = arith.constant 0 : i32
    return %arg0, %c0_i32 : i32, i32
  }
}

</mosaic_0001>

<bundles_post_ra>
// kernel: tpu_custom_call.1
= control target key start
LH: loop header
LB: loop body
LE: loop exit
PB: predicated region body
PF: predicated region fallthrough
CT: control target
= control target key end

     0   :  { %8 = vsyncpa [#allocation3], 0  ;;  %s272_s0 = inlined_call_operand.hbm [shape: f32[8,10], index: 0, kind: input, shape index: {}]   ;;  %s273_s1 = inlined_call_operand.hbm [shape: f32[10,20], index: 1, kind: input, shape index: {}]   ;;  %s274_s2 = inlined_call_operand.vmem [shape: f32[1,20], index: 2, kind: input, shape index: {}]   ;;  %s275_s3 = inlined_call_operand.hbm [shape: f32[8,20], index: 3, kind: output, shape index: {}]  }
   0x1   :  { %9 = vsyncpa [#allocation6], 0 }
   0x2   :  { %10 = vsyncpa [#allocation4], 0  ;;  %s233_s12 = smov [#allocation2]   ;;  %s234_s14 = smov [#allocation5]  }
   0x3   :  { %s17_s13 = sshll.u32 %s233_s12, 4  ;;  %s26_s15 = sshll.u32 %s234_s14, 4  ;;  %s18_s13 = int_to_ptr.vmem [resolvable:$true] %s17_s13  ;;  %s27_s15 = int_to_ptr.vmem [resolvable:$true] %s26_s15 }
   0x4   :  { %s175_s16 = scalar_lea.vmem %s18_s13, 128  ;;  %p180_p1 = scmp.lt.s32.totalorder %s18_s13, %s18_s13 }
   0x5   :  { %p176_p0 = scmp.ne.s32.totalorder %s18_s13, %s175_s16  ;;  %p181_p2 = scmp.lt.s32.totalorder %s175_s16, %s175_s16 }
   0x7   :  { %p182_p3 = por %p181_p2, %p180_p1 }
   0x9   :  { %p183_p4 = pnand %p182_p3, %p176_p0 }
   0xb   :  { %186 = shalt.err (!%p183_p4)
}
   0xc   :  { %20 = dma.hbm_to_vmem [thread:$0]  %s272_s0, 128, %s18_s13, [#allocation3]  }
   0xd   :  { %s195_s19 = scalar_lea.vmem %s27_s15, 256  ;;  %p200_p6 = scmp.lt.s32.totalorder %s27_s15, %s27_s15 }
   0xe   :  { %p196_p5 = scmp.ne.s32.totalorder %s27_s15, %s195_s19  ;;  %p201_p7 = scmp.lt.s32.totalorder %s195_s19, %s195_s19 }
  0x10   :  { %p202_p8 = por %p201_p7, %p200_p6 }
  0x12   :  { %p203_p9 = pnand %p202_p8, %p196_p5 }
  0x14   :  { %206 = shalt.err (!%p203_p9)
}
  0x15   :  { %s235_s20 = smov 128   ;;  %s236_s21 = smov 8  }
  0x16   :  { %32 = dma.hbm_to_vmem [thread:$0]  %s273_s1, 256, %s27_s15, [#allocation6], %s235_s20, %s235_s20, %s236_s21  }
  0x17   :  { %227 = dma.done.wait [#allocation3], 128  }
  0x18   :  { %228 = vsyncadd [#allocation3], 4294967168 }
  0x19   :  { %229 = dma.done.wait [#allocation6], 256  }
  0x1a   :  { %230 = vsyncadd [#allocation6], 4294967040  ;;  %v237_v0 = vmov 0.0   ;;  %vm238_vm0 = vmmov 0   ;;  %vm55_vm1 = vcmask 1041408   ;;  %v42_v2 = vld [vmem:[#allocation5] sm:$0xff] }
  0x1b   :  { %153 = vmatprep.subr.mxu0 %v237_v0  ;;  %157 = vmatprep.mubr.msk.f32.mxu0 %vm238_vm0, %v237_v0  ;;  %v43_v1 = vld [vmem:[#allocation5 + $0x8] sm:$0x3]  ;;  %v41_v3 = vld [vmem:[#allocation2] sm:$0xff]  ;;  %vm51_vm2 = vcmask 80896   ;;  %s239_s1 = smov [#allocation7]   ;;  %vm129_vm3 = vcmask 162816  }
  0x1c   :  { %154 = vmatpush3.msk.msra.mxu0 %vm55_vm1, %v43_v1  ;;  %v147_v4 = vld [vmem:[%s274_s2] ss:$0 sm:$0xff]  ;;  %s137_s25 = sshll.u32 %s239_s1, 4  ;;  %s138_s25 = int_to_ptr.vmem [resolvable:$true] %s137_s25 }
  0x1d   :  { %155 = vmatprep.subr.mxu0 %v237_v0  ;;  %s207_s26 = scalar_lea.vmem %s138_s25, 128  ;;  %p212_p11 = scmp.lt.s32.totalorder %s138_s25, %s138_s25 }
  0x1e   :  { %156 = vmatpush3.msra.mxu0 %v42_v2  ;;  %p208_p10 = scmp.ne.s32.totalorder %s138_s25, %s207_s26  ;;  %p213_p12 = scmp.lt.s32.totalorder %s207_s26, %s207_s26 }
  0x1f   :  { %158 = vmatmul.mubr.msk.f32.vlgmr.msra.gmra.mxu0 %vm51_vm2, %v41_v3 }
  0x20   :  { %p214_p13 = por %p213_p12, %p212_p11 }
  0x22   :  { %p215_p0 = pnand %p214_p13, %p208_p10 }
  0xdf   :  { %v125_v5 = vpop.f32.mrf.mxu0 }
  0xe0   :  { %v126_v6 = vadd.f32 %v147_v4, %v125_v5 }
  0xe1   :  { %v159_v7 = vpop.f32.mrf.mxu0 }
  0xe2   :  { %130 = vst.msk [vmem:[#allocation7] sm:$0xff] %vm129_vm3, %v126_v6 }
  0xe3   :  { %218 = shalt.err (!%p215_p0)
}
  0xe4   :  { %140 = dma.vmem_to_hbm [thread:$0]  %s138_s25, 128, %s275_s3, [#allocation4]  }
  0xe5   :  { %231 = dma.done.wait [#allocation4], 128  }
  0xe6   :  { %232 = vsyncadd [#allocation4], 4294967168 }
  0xe7   :  { %144 = vsyncpa [#allocation3], 1 }
  0xe8   :  { %145 = vsyncpa [#allocation6], 1 }
  0xe9   :  { %146 = vsyncpa [#allocation4], 1 }

</bundles_post_ra>
